<compile_context>
chip_gen: v7x
topology: tpu7x:2x2x1
jax: 0.10.0
libtpu: 0.0.40
codegen_flags: <defaults>
</compile_context>

<pallas_src>
import functools

import jax
import jax.numpy as jnp
from jax import lax
from jax.experimental import pallas as pl
from jax.experimental.pallas import tpu as pltpu

_EPS = 1e-5  # PyTorch BatchNorm2d default eps


# ----------------------------------------------------------------------------
# Fused Pallas kernel: whole bottleneck block for one image per grid step.
# ----------------------------------------------------------------------------
def _fused_bottleneck_kernel(
        x_ref, m_ref,
        w1u_ref, b1u_ref, w1v_ref, b1v_ref,
        w2u_ref, b2u_ref, w2v_ref, b2v_ref,
        w3u_ref, b3u_ref, w3v_ref, b3v_ref,
        o_ref, *, H, W):
    f32 = jnp.float32
    lp = jnp.bfloat16
    HW = H * W

    x = x_ref[0]                                                 # [Cin, HW]
    x_res = x.astype(f32)                                        # residual (f32)

    # conv1_u (1x1) + bn1_u   (BN scale pre-folded into the bf16 weight)
    h = jnp.dot(w1u_ref[...], x.astype(lp), preferred_element_type=f32) + b1u_ref[...]
    # conv1_v (1x1) + bn1_v + relu
    h = jnp.dot(w1v_ref[...], h.astype(lp), preferred_element_type=f32) + b1v_ref[...]
    h = jnp.maximum(h, 0.0)                                      # [width, HW] f32

    # conv2_u (3x3, stride 1, pad 1) + bn2_u
    # Nine lane-rolled, mask-multiplied taps stacked along the contraction
    # dim and contracted with the pre-flattened [r1, 9*width] weight in ONE
    # MXU matmul.  Masks are precomputed [1, HW] constants (one per tap).
    taps = []
    k = 0
    for sy in (-1, 0, 1):
        for sx in (-1, 0, 1):
            d = sy * W + sx
            if d == 0:
                taps.append(h)
            else:
                # shifted[:, p] == h[:, (p + d) mod HW]; wrapped pixels are
                # zeroed by the per-tap validity mask.
                shifted = pltpu.roll(h, shift=(-d) % HW, axis=1)
                taps.append(shifted * m_ref[k])
            k += 1
    stacked = jnp.concatenate(taps, axis=0).astype(lp)           # [9*width, HW]
    h = jnp.dot(w2u_ref[...], stacked, preferred_element_type=f32) + b2u_ref[...]

    # conv2_v (1x1) + bn2_v + relu
    h = jnp.dot(w2v_ref[...], h.astype(lp), preferred_element_type=f32) + b2v_ref[...]
    h = jnp.maximum(h, 0.0)
    # conv3_u (1x1) + bn3_u
    h = jnp.dot(w3u_ref[...], h.astype(lp), preferred_element_type=f32) + b3u_ref[...]
    # conv3_v (1x1) + bn3_v + residual (downsample=None) + relu
    y = jnp.dot(w3v_ref[...], h.astype(lp), preferred_element_type=f32) + b3v_ref[...]
    o_ref[0] = jnp.maximum(y + x_res, 0.0).astype(o_ref.dtype)   # [out_ch, HW]


# ----------------------------------------------------------------------------
# Per-tap validity masks (precomputed constants, [9, 1, H*W] f32).
# ----------------------------------------------------------------------------
def _tap_masks(H, W):
    HW = H * W
    row = jnp.arange(HW, dtype=jnp.int32) // W
    col = jnp.arange(HW, dtype=jnp.int32) % W
    masks = []
    for sy in (-1, 0, 1):
        for sx in (-1, 0, 1):
            ok = jnp.ones((HW,), jnp.bool_)
            if sy != 0:
                ok = ok & (row + sy >= 0) & (row + sy < H)
            if sx != 0:
                ok = ok & (col + sx >= 0) & (col + sx < W)
            masks.append(ok)
    return jnp.stack(masks, axis=0).astype(jnp.float32).reshape(9, 1, HW)


# ----------------------------------------------------------------------------
# Generation-aware VMEM budget (accounts for stacked taps + accumulators).
# ----------------------------------------------------------------------------
def _vmem_limit_bytes(Cin, out_ch, width, r1, HW, x_itemsize, weights):
    try:
        cap = int(pltpu.get_tpu_info().vmem_capacity_bytes)
    except Exception:                                   # noqa: BLE001
        cap = 64 * 1024 * 1024                          # conservative (v7x-sized)
    cap = int(0.75 * cap)                               # ~96 MiB v5e/v6e, ~48 MiB v7x
    f32b = 4
    need = (2 * (Cin + out_ch) * HW * x_itemsize                 # dbl-buffered I/O slabs
            + (Cin + 4 * width + r1 + out_ch) * HW * f32b        # live f32 intermediates
            + 9 * width * HW * (f32b + 2)                        # stacked taps f32 + bf16
            + 9 * HW * f32b                                      # tap masks
            + 2 * sum(int(a.size) * a.dtype.itemsize for a in weights))
    return int(min(max(int(1.25 * need), 16 * 1024 * 1024), cap))


# ----------------------------------------------------------------------------
# Wrapper: NCHW in / NCHW out, single pallas_call over the batch.
# ----------------------------------------------------------------------------
def adapt_lowrank_bottleneck_forward(x_nchw, p):
    N, Cin, H, W = x_nchw.shape
    HW = H * W
    out_ch = p['w3v'].shape[0]
    width = p['w1v'].shape[0]
    r1 = p['w2u'].shape[0]

    # NCHW -> [N, C, H*W] is a free reshape (no transpose).
    x3 = x_nchw.reshape(N, Cin, HW)
    masks = _tap_masks(H, W)

    weights = (p['w1u'], p['b1u'], p['w1v'], p['b1v'],
               p['w2u'], p['b2u'], p['w2v'], p['b2v'],
               p['w3u'], p['b3u'], p['w3v'], p['b3v'])

    def resident(a):
        nd = a.ndim
        return pl.BlockSpec(a.shape, lambda *_: (0,) * nd)

    vmem_limit = _vmem_limit_bytes(Cin, out_ch, width, r1, HW,
                                   x_nchw.dtype.itemsize, weights)

    kernel = functools.partial(_fused_bottleneck_kernel, H=H, W=W)
    out = pl.pallas_call(
        kernel,
        out_shape=jax.ShapeDtypeStruct((N, out_ch, HW), x_nchw.dtype),
        grid=(N,),
        in_specs=[pl.BlockSpec((1, Cin, HW), lambda n: (n, 0, 0)),
                  resident(masks)]
                 + [resident(a) for a in weights],
        out_specs=pl.BlockSpec((1, out_ch, HW), lambda n: (n, 0, 0)),
        compiler_params=pltpu.CompilerParams(
            dimension_semantics=("parallel",),
            vmem_limit_bytes=vmem_limit),
    )(x3, masks, *weights)
    return out.reshape(N, out_ch, H, W)


# ----------------------------------------------------------------------------
# Plain-JAX glue: fold BN (inference mode) into weights/shifts; weights -> bf16.
# ----------------------------------------------------------------------------
def prep_params(raw):
    def fold(bn):
        gamma, beta, mean, var = bn
        s = gamma / jnp.sqrt(var + _EPS)
        return s, beta - mean * s

    s1u, b1u = fold(raw['bn1_u']); s1v, b1v = fold(raw['bn1_v'])
    s2u, b2u = fold(raw['bn2_u']); s2v, b2v = fold(raw['bn2_v'])
    s3u, b3u = fold(raw['bn3_u']); s3v, b3v = fold(raw['bn3_v'])

    def w1x1(w, s):      # [Cout, Cin, 1, 1] -> BN-scaled bf16 [Cout, Cin]
        return (w[:, :, 0, 0] * s[:, None]).astype(jnp.bfloat16)

    def w3x3(w, s):      # [Cout, Cin, 3, 3] -> BN-scaled bf16 [Cout, 9*Cin],
        # columns ordered (tap k = dy*3+dx, cin) to match the in-kernel stack.
        cout, cin = w.shape[0], w.shape[1]
        wf = w * s[:, None, None, None]
        wf = jnp.transpose(wf, (0, 2, 3, 1)).reshape(cout, 9 * cin)
        return wf.astype(jnp.bfloat16)

    col = lambda b: b.reshape(-1, 1).astype(jnp.float32)

    return {
        'w1u': w1x1(raw['conv1_u'], s1u), 'b1u': col(b1u),
        'w1v': w1x1(raw['conv1_v'], s1v), 'b1v': col(b1v),
        'w2u': w3x3(raw['conv2_u'], s2u), 'b2u': col(b2u),
        'w2v': w1x1(raw['conv2_v'], s2v), 'b2v': col(b2v),
        'w3u': w1x1(raw['conv3_u'], s3u), 'b3u': col(b3u),
        'w3v': w1x1(raw['conv3_v'], s3v), 'b3v': col(b3v),
    }


# ----------------------------------------------------------------------------
# Deterministic parameter init (PyTorch-shaped) + pure-JAX reference.
# ----------------------------------------------------------------------------
def init_raw_params(key, inplanes, planes, est_rank, base_width=64, groups=1):
    width = int(planes * (base_width / 64.0)) * groups
    out_ch = planes * 4
    r0, r1, r2 = est_rank
    keys = iter(jax.random.split(key, 64))

    def conv_w(cout, cin, k):
        return 0.1 * jax.random.normal(next(keys), (cout, cin, k, k), jnp.float32)

    def bn_p(c):
        gamma = 0.5 + jax.random.uniform(next(keys), (c,), jnp.float32)
        beta = 0.1 * jax.random.normal(next(keys), (c,), jnp.float32)
        mean = 0.1 * jax.random.normal(next(keys), (c,), jnp.float32)
        var = 0.5 + jax.random.uniform(next(keys), (c,), jnp.float32)
        return gamma, beta, mean, var

    return {
        'conv1_u': conv_w(r0, inplanes, 1), 'bn1_u': bn_p(r0),
        'conv1_v': conv_w(width, r0, 1),    'bn1_v': bn_p(width),
        'conv2_u': conv_w(r1, width, 3),    'bn2_u': bn_p(r1),
        'conv2_v': conv_w(width, r1, 1),    'bn2_v': bn_p(width),
        'conv3_u': conv_w(r2, width, 1),    'bn3_u': bn_p(r2),
        'conv3_v': conv_w(out_ch, r2, 1),   'bn3_v': bn_p(out_ch),
    }


def ref_forward(x, raw):
    hp = lax.Precision.HIGHEST

    def c1(t, w):
        return jnp.einsum('nchw,oc->nohw', t, w[:, :, 0, 0], precision=hp)

    def c3(t, w):
        return lax.conv_general_dilated(
            t, w, (1, 1), ((1, 1), (1, 1)),
            dimension_numbers=('NCHW', 'OIHW', 'NCHW'), precision=hp)

    def bn(t, params):
        gamma, beta, mean, var = params
        s = gamma / jnp.sqrt(var + _EPS)
        return t * s[None, :, None, None] + (beta - mean * s)[None, :, None, None]

    relu = lambda t: jnp.maximum(t, 0.0)
    out = bn(c1(x, raw['conv1_u']), raw['bn1_u'])
    out = relu(bn(c1(out, raw['conv1_v']), raw['bn1_v']))
    out = bn(c3(out, raw['conv2_u']), raw['bn2_u'])
    out = relu(bn(c1(out, raw['conv2_v']), raw['bn2_v']))
    out = bn(c1(out, raw['conv3_u']), raw['bn3_u'])
    out = bn(c1(out, raw['conv3_v']), raw['bn3_v'])
    return relu(out + x)


if __name__ == "__main__":
    key = jax.random.PRNGKey(0)
    # Shapes chosen so the residual add is valid with downsample=None:
    # inplanes == planes * expansion, stride == 1.
    N, H, W = 2, 16, 16
    planes = 8
    inplanes = planes * 4          # 32
    est_rank = (4, 4, 4)

    k_x, k_p = jax.random.split(key)
    x = jax.random.normal(k_x, (N, inplanes, H, W), jnp.float32)
    raw = init_raw_params(k_p, inplanes, planes, est_rank)
    params = prep_params(raw)

    out = jax.jit(adapt_lowrank_bottleneck_forward)(x, params)
    out = jax.block_until_ready(out)

    ref = ref_forward(x, raw)
    assert out.shape == (N, planes * 4, H, W), out.shape
    max_err = float(jnp.max(jnp.abs(out - ref)))
    # bf16 matmul operands (f32 accumulation) vs. f32 HIGHEST-precision reference.
    assert jnp.allclose(out, ref, atol=2e-2, rtol=2e-2), max_err

    print("KERNEL_OK")
</pallas_src>

<mosaic_0001>
module attributes {stable_mosaic.version = 11 : i64} {
  func.func @_fused_bottleneck_kernel(%arg0: i32, %arg1: memref<1x32x256xf32, #tpu.memory_space<vmem>>, %arg2: memref<9x1x256xf32, #tpu.memory_space<vmem>>, %arg3: memref<4x32xbf16, #tpu.memory_space<vmem>>, %arg4: memref<4x1xf32, #tpu.memory_space<vmem>>, %arg5: memref<8x4xbf16, #tpu.memory_space<vmem>>, %arg6: memref<8x1xf32, #tpu.memory_space<vmem>>, %arg7: memref<4x72xbf16, #tpu.memory_space<vmem>>, %arg8: memref<4x1xf32, #tpu.memory_space<vmem>>, %arg9: memref<8x4xbf16, #tpu.memory_space<vmem>>, %arg10: memref<8x1xf32, #tpu.memory_space<vmem>>, %arg11: memref<4x8xbf16, #tpu.memory_space<vmem>>, %arg12: memref<4x1xf32, #tpu.memory_space<vmem>>, %arg13: memref<32x4xbf16, #tpu.memory_space<vmem>>, %arg14: memref<32x1xf32, #tpu.memory_space<vmem>>, %arg15: memref<1x32x256xf32, #tpu.memory_space<vmem>>) attributes {dimension_semantics = [#tpu.dimension_semantics<parallel>], iteration_bounds = array<i64: 2>, scalar_prefetch = 0 : i64, scratch_operands = 0 : i64, tpu.core_type = #tpu.core_type<tc>, window_params = [{transform_indices = @transform_0, window_bounds = array<i64: 1, 32, 256>}, {pipeline_mode = #tpu.pipeline_mode<synchronous>, transform_indices = @transform_1, window_bounds = array<i64: 9, 1, 256>}, {pipeline_mode = #tpu.pipeline_mode<synchronous>, transform_indices = @transform_2, window_bounds = array<i64: 4, 32>}, {pipeline_mode = #tpu.pipeline_mode<synchronous>, transform_indices = @transform_3, window_bounds = array<i64: 4, 1>}, {pipeline_mode = #tpu.pipeline_mode<synchronous>, transform_indices = @transform_4, window_bounds = array<i64: 8, 4>}, {pipeline_mode = #tpu.pipeline_mode<synchronous>, transform_indices = @transform_5, window_bounds = array<i64: 8, 1>}, {pipeline_mode = #tpu.pipeline_mode<synchronous>, transform_indices = @transform_6, window_bounds = array<i64: 4, 72>}, {pipeline_mode = #tpu.pipeline_mode<synchronous>, transform_indices = @transform_7, window_bounds = array<i64: 4, 1>}, {pipeline_mode = #tpu.pipeline_mode<synchronous>, transform_indices = @transform_8, window_bounds = array<i64: 8, 4>}, {pipeline_mode = #tpu.pipeline_mode<synchronous>, transform_indices = @transform_9, window_bounds = array<i64: 8, 1>}, {pipeline_mode = #tpu.pipeline_mode<synchronous>, transform_indices = @transform_10, window_bounds = array<i64: 4, 8>}, {pipeline_mode = #tpu.pipeline_mode<synchronous>, transform_indices = @transform_11, window_bounds = array<i64: 4, 1>}, {pipeline_mode = #tpu.pipeline_mode<synchronous>, transform_indices = @transform_12, window_bounds = array<i64: 32, 4>}, {pipeline_mode = #tpu.pipeline_mode<synchronous>, transform_indices = @transform_13, window_bounds = array<i64: 32, 1>}, {transform_indices = @transform_14, window_bounds = array<i64: 1, 32, 256>}]} {
    %c0 = arith.constant 0 : index
    %c0_0 = arith.constant 0 : index
    %c0_1 = arith.constant 0 : index
    %0 = vector.load %arg1[%c0, %c0_0, %c0_1] : memref<1x32x256xf32, #tpu.memory_space<vmem>>, vector<1x32x256xf32>
    %1 = vector.shape_cast %0 : vector<1x32x256xf32> to vector<32x256xf32>
    %c0_2 = arith.constant 0 : index
    %c0_3 = arith.constant 0 : index
    %2 = vector.load %arg3[%c0_2, %c0_3] : memref<4x32xbf16, #tpu.memory_space<vmem>>, vector<4x32xbf16>
    %3 = arith.truncf %1 : vector<32x256xf32> to vector<32x256xbf16>
    %cst = arith.constant dense<0.000000e+00> : vector<4x256xf32>
    %4 = tpu.matmul %2, %3, %cst {dimension_numbers = #tpu.dot_dimension_numbers<[1], [0], [0], [1], [0, 0, 1, 1], [], []>} : vector<4x32xbf16>, vector<32x256xbf16>, vector<4x256xf32> -> vector<4x256xf32>
    %c0_4 = arith.constant 0 : index
    %c0_5 = arith.constant 0 : index
    %5 = vector.load %arg4[%c0_4, %c0_5] : memref<4x1xf32, #tpu.memory_space<vmem>>, vector<4x1xf32>
    %6 = vector.broadcast %5 : vector<4x1xf32> to vector<4x256xf32>
    %7 = arith.addf %4, %6 : vector<4x256xf32>
    %c0_6 = arith.constant 0 : index
    %c0_7 = arith.constant 0 : index
    %8 = vector.load %arg5[%c0_6, %c0_7] : memref<8x4xbf16, #tpu.memory_space<vmem>>, vector<8x4xbf16>
    %9 = arith.truncf %7 : vector<4x256xf32> to vector<4x256xbf16>
    %cst_8 = arith.constant dense<0.000000e+00> : vector<8x256xf32>
    %10 = tpu.matmul %8, %9, %cst_8 {dimension_numbers = #tpu.dot_dimension_numbers<[1], [0], [0], [1], [0, 0, 1, 1], [], []>} : vector<8x4xbf16>, vector<4x256xbf16>, vector<8x256xf32> -> vector<8x256xf32>
    %c0_9 = arith.constant 0 : index
    %c0_10 = arith.constant 0 : index
    %11 = vector.load %arg6[%c0_9, %c0_10] : memref<8x1xf32, #tpu.memory_space<vmem>>, vector<8x1xf32>
    %12 = vector.broadcast %11 : vector<8x1xf32> to vector<8x256xf32>
    %13 = arith.addf %10, %12 : vector<8x256xf32>
    %cst_11 = arith.constant 0.000000e+00 : f32
    %14 = vector.broadcast %cst_11 : f32 to vector<8x256xf32>
    %15 = arith.maximumf %13, %14 : vector<8x256xf32>
    %c17_i32 = arith.constant 17 : i32
    %16 = tpu.dynamic_rotate %15 by %c17_i32 dim 1 : vector<8x256xf32>, i32 -> vector<8x256xf32>
    %c0_12 = arith.constant 0 : index
    %c0_13 = arith.constant 0 : index
    %c0_14 = arith.constant 0 : index
    %17 = vector.load %arg2[%c0_12, %c0_13, %c0_14] : memref<9x1x256xf32, #tpu.memory_space<vmem>>, vector<1x1x256xf32>
    %18 = vector.shape_cast %17 : vector<1x1x256xf32> to vector<1x256xf32>
    %19 = vector.broadcast %18 : vector<1x256xf32> to vector<8x256xf32>
    %20 = arith.mulf %16, %19 : vector<8x256xf32>
    %c16_i32 = arith.constant 16 : i32
    %21 = tpu.dynamic_rotate %15 by %c16_i32 dim 1 : vector<8x256xf32>, i32 -> vector<8x256xf32>
    %c1 = arith.constant 1 : index
    %c0_15 = arith.constant 0 : index
    %c0_16 = arith.constant 0 : index
    %22 = vector.load %arg2[%c1, %c0_15, %c0_16] : memref<9x1x256xf32, #tpu.memory_space<vmem>>, vector<1x1x256xf32>
    %23 = vector.shape_cast %22 : vector<1x1x256xf32> to vector<1x256xf32>
    %24 = vector.broadcast %23 : vector<1x256xf32> to vector<8x256xf32>
    %25 = arith.mulf %21, %24 : vector<8x256xf32>
    %c15_i32 = arith.constant 15 : i32
    %26 = tpu.dynamic_rotate %15 by %c15_i32 dim 1 : vector<8x256xf32>, i32 -> vector<8x256xf32>
    %c2 = arith.constant 2 : index
    %c0_17 = arith.constant 0 : index
    %c0_18 = arith.constant 0 : index
    %27 = vector.load %arg2[%c2, %c0_17, %c0_18] : memref<9x1x256xf32, #tpu.memory_space<vmem>>, vector<1x1x256xf32>
    %28 = vector.shape_cast %27 : vector<1x1x256xf32> to vector<1x256xf32>
    %29 = vector.broadcast %28 : vector<1x256xf32> to vector<8x256xf32>
    %30 = arith.mulf %26, %29 : vector<8x256xf32>
    %c1_i32 = arith.constant 1 : i32
    %31 = tpu.dynamic_rotate %15 by %c1_i32 dim 1 : vector<8x256xf32>, i32 -> vector<8x256xf32>
    %c3 = arith.constant 3 : index
    %c0_19 = arith.constant 0 : index
    %c0_20 = arith.constant 0 : index
    %32 = vector.load %arg2[%c3, %c0_19, %c0_20] : memref<9x1x256xf32, #tpu.memory_space<vmem>>, vector<1x1x256xf32>
    %33 = vector.shape_cast %32 : vector<1x1x256xf32> to vector<1x256xf32>
    %34 = vector.broadcast %33 : vector<1x256xf32> to vector<8x256xf32>
    %35 = arith.mulf %31, %34 : vector<8x256xf32>
    %c255_i32 = arith.constant 255 : i32
    %36 = tpu.dynamic_rotate %15 by %c255_i32 dim 1 : vector<8x256xf32>, i32 -> vector<8x256xf32>
    %c5 = arith.constant 5 : index
    %c0_21 = arith.constant 0 : index
    %c0_22 = arith.constant 0 : index
    %37 = vector.load %arg2[%c5, %c0_21, %c0_22] : memref<9x1x256xf32, #tpu.memory_space<vmem>>, vector<1x1x256xf32>
    %38 = vector.shape_cast %37 : vector<1x1x256xf32> to vector<1x256xf32>
    %39 = vector.broadcast %38 : vector<1x256xf32> to vector<8x256xf32>
    %40 = arith.mulf %36, %39 : vector<8x256xf32>
    %c241_i32 = arith.constant 241 : i32
    %41 = tpu.dynamic_rotate %15 by %c241_i32 dim 1 : vector<8x256xf32>, i32 -> vector<8x256xf32>
    %c6 = arith.constant 6 : index
    %c0_23 = arith.constant 0 : index
    %c0_24 = arith.constant 0 : index
    %42 = vector.load %arg2[%c6, %c0_23, %c0_24] : memref<9x1x256xf32, #tpu.memory_space<vmem>>, vector<1x1x256xf32>
    %43 = vector.shape_cast %42 : vector<1x1x256xf32> to vector<1x256xf32>
    %44 = vector.broadcast %43 : vector<1x256xf32> to vector<8x256xf32>
    %45 = arith.mulf %41, %44 : vector<8x256xf32>
    %c240_i32 = arith.constant 240 : i32
    %46 = tpu.dynamic_rotate %15 by %c240_i32 dim 1 : vector<8x256xf32>, i32 -> vector<8x256xf32>
    %c7 = arith.constant 7 : index
    %c0_25 = arith.constant 0 : index
    %c0_26 = arith.constant 0 : index
    %47 = vector.load %arg2[%c7, %c0_25, %c0_26] : memref<9x1x256xf32, #tpu.memory_space<vmem>>, vector<1x1x256xf32>
    %48 = vector.shape_cast %47 : vector<1x1x256xf32> to vector<1x256xf32>
    %49 = vector.broadcast %48 : vector<1x256xf32> to vector<8x256xf32>
    %50 = arith.mulf %46, %49 : vector<8x256xf32>
    %c239_i32 = arith.constant 239 : i32
    %51 = tpu.dynamic_rotate %15 by %c239_i32 dim 1 : vector<8x256xf32>, i32 -> vector<8x256xf32>
    %c8 = arith.constant 8 : index
    %c0_27 = arith.constant 0 : index
    %c0_28 = arith.constant 0 : index
    %52 = vector.load %arg2[%c8, %c0_27, %c0_28] : memref<9x1x256xf32, #tpu.memory_space<vmem>>, vector<1x1x256xf32>
    %53 = vector.shape_cast %52 : vector<1x1x256xf32> to vector<1x256xf32>
    %54 = vector.broadcast %53 : vector<1x256xf32> to vector<8x256xf32>
    %55 = arith.mulf %51, %54 : vector<8x256xf32>
    %56 = tpu.concatenate %20, %25, %30, %35, %15, %40, %45, %50, %55 in 0 : vector<8x256xf32>, vector<8x256xf32>, vector<8x256xf32>, vector<8x256xf32>, vector<8x256xf32>, vector<8x256xf32>, vector<8x256xf32>, vector<8x256xf32>, vector<8x256xf32> -> vector<72x256xf32>
    %57 = arith.truncf %56 : vector<72x256xf32> to vector<72x256xbf16>
    %c0_29 = arith.constant 0 : index
    %c0_30 = arith.constant 0 : index
    %58 = vector.load %arg7[%c0_29, %c0_30] : memref<4x72xbf16, #tpu.memory_space<vmem>>, vector<4x72xbf16>
    %cst_31 = arith.constant dense<0.000000e+00> : vector<4x256xf32>
    %59 = tpu.matmul %58, %57, %cst_31 {dimension_numbers = #tpu.dot_dimension_numbers<[1], [0], [0], [1], [0, 0, 1, 1], [], []>} : vector<4x72xbf16>, vector<72x256xbf16>, vector<4x256xf32> -> vector<4x256xf32>
    %c0_32 = arith.constant 0 : index
    %c0_33 = arith.constant 0 : index
    %60 = vector.load %arg8[%c0_32, %c0_33] : memref<4x1xf32, #tpu.memory_space<vmem>>, vector<4x1xf32>
    %61 = vector.broadcast %60 : vector<4x1xf32> to vector<4x256xf32>
    %62 = arith.addf %59, %61 : vector<4x256xf32>
    %c0_34 = arith.constant 0 : index
    %c0_35 = arith.constant 0 : index
    %63 = vector.load %arg9[%c0_34, %c0_35] : memref<8x4xbf16, #tpu.memory_space<vmem>>, vector<8x4xbf16>
    %64 = arith.truncf %62 : vector<4x256xf32> to vector<4x256xbf16>
    %cst_36 = arith.constant dense<0.000000e+00> : vector<8x256xf32>
    %65 = tpu.matmul %63, %64, %cst_36 {dimension_numbers = #tpu.dot_dimension_numbers<[1], [0], [0], [1], [0, 0, 1, 1], [], []>} : vector<8x4xbf16>, vector<4x256xbf16>, vector<8x256xf32> -> vector<8x256xf32>
    %c0_37 = arith.constant 0 : index
    %c0_38 = arith.constant 0 : index
    %66 = vector.load %arg10[%c0_37, %c0_38] : memref<8x1xf32, #tpu.memory_space<vmem>>, vector<8x1xf32>
    %67 = vector.broadcast %66 : vector<8x1xf32> to vector<8x256xf32>
    %68 = arith.addf %65, %67 : vector<8x256xf32>
    %cst_39 = arith.constant 0.000000e+00 : f32
    %69 = vector.broadcast %cst_39 : f32 to vector<8x256xf32>
    %70 = arith.maximumf %68, %69 : vector<8x256xf32>
    %c0_40 = arith.constant 0 : index
    %c0_41 = arith.constant 0 : index
    %71 = vector.load %arg11[%c0_40, %c0_41] : memref<4x8xbf16, #tpu.memory_space<vmem>>, vector<4x8xbf16>
    %72 = arith.truncf %70 : vector<8x256xf32> to vector<8x256xbf16>
    %cst_42 = arith.constant dense<0.000000e+00> : vector<4x256xf32>
    %73 = tpu.matmul %71, %72, %cst_42 {dimension_numbers = #tpu.dot_dimension_numbers<[1], [0], [0], [1], [0, 0, 1, 1], [], []>} : vector<4x8xbf16>, vector<8x256xbf16>, vector<4x256xf32> -> vector<4x256xf32>
    %c0_43 = arith.constant 0 : index
    %c0_44 = arith.constant 0 : index
    %74 = vector.load %arg12[%c0_43, %c0_44] : memref<4x1xf32, #tpu.memory_space<vmem>>, vector<4x1xf32>
    %75 = vector.broadcast %74 : vector<4x1xf32> to vector<4x256xf32>
    %76 = arith.addf %73, %75 : vector<4x256xf32>
    %c0_45 = arith.constant 0 : index
    %c0_46 = arith.constant 0 : index
    %77 = vector.load %arg13[%c0_45, %c0_46] : memref<32x4xbf16, #tpu.memory_space<vmem>>, vector<32x4xbf16>
    %78 = arith.truncf %76 : vector<4x256xf32> to vector<4x256xbf16>
    %cst_47 = arith.constant dense<0.000000e+00> : vector<32x256xf32>
    %79 = tpu.matmul %77, %78, %cst_47 {dimension_numbers = #tpu.dot_dimension_numbers<[1], [0], [0], [1], [0, 0, 1, 1], [], []>} : vector<32x4xbf16>, vector<4x256xbf16>, vector<32x256xf32> -> vector<32x256xf32>
    %c0_48 = arith.constant 0 : index
    %c0_49 = arith.constant 0 : index
    %80 = vector.load %arg14[%c0_48, %c0_49] : memref<32x1xf32, #tpu.memory_space<vmem>>, vector<32x1xf32>
    %81 = vector.broadcast %80 : vector<32x1xf32> to vector<32x256xf32>
    %82 = arith.addf %79, %81 : vector<32x256xf32>
    %83 = arith.addf %82, %1 : vector<32x256xf32>
    %cst_50 = arith.constant 0.000000e+00 : f32
    %84 = vector.broadcast %cst_50 : f32 to vector<32x256xf32>
    %85 = arith.maximumf %83, %84 : vector<32x256xf32>
    %c0_51 = arith.constant 0 : index
    %c0_52 = arith.constant 0 : index
    %c0_53 = arith.constant 0 : index
    %86 = vector.load %arg15[%c0_51, %c0_52, %c0_53] : memref<1x32x256xf32, #tpu.memory_space<vmem>>, vector<1x32x256xf32>
    %87 = vector.shape_cast %86 : vector<1x32x256xf32> to vector<32x256xf32>
    %88 = vector.shape_cast %85 : vector<32x256xf32> to vector<1x32x256xf32>
    tpu.vector_store %arg15[%c0_51, %c0_52, %c0_53], %88 {strides = array<i32>} : memref<1x32x256xf32, #tpu.memory_space<vmem>>, vector<1x32x256xf32>,
    return
  }
  func.func @transform_0(%arg0: i32) -> (i32, i32, i32) {
    %c0_i32 = arith.constant 0 : i32
    %c0_i32_0 = arith.constant 0 : i32
    %c0_i32_1 = arith.constant 0 : i32
    return %arg0, %c0_i32, %c0_i32_0 : i32, i32, i32
  }
  func.func @transform_1(%arg0: i32) -> (i32, i32, i32) {
    %c0_i32 = arith.constant 0 : i32
    %c0_i32_0 = arith.constant 0 : i32
    %c0_i32_1 = arith.constant 0 : i32
    %c0_i32_2 = arith.constant 0 : i32
    return %c0_i32, %c0_i32_0, %c0_i32_1 : i32, i32, i32
  }
  func.func @transform_2(%arg0: i32) -> (i32, i32) {
    %c0_i32 = arith.constant 0 : i32
    %c0_i32_0 = arith.constant 0 : i32
    %c0_i32_1 = arith.constant 0 : i32
    return %c0_i32, %c0_i32_0 : i32, i32
  }
  func.func @transform_3(%arg0: i32) -> (i32, i32) {
    %c0_i32 = arith.constant 0 : i32
    %c0_i32_0 = arith.constant 0 : i32
    %c0_i32_1 = arith.constant 0 : i32
    return %c0_i32, %c0_i32_0 : i32, i32
  }
  func.func @transform_4(%arg0: i32) -> (i32, i32) {
    %c0_i32 = arith.constant 0 : i32
    %c0_i32_0 = arith.constant 0 : i32
    %c0_i32_1 = arith.constant 0 : i32
    return %c0_i32, %c0_i32_0 : i32, i32
  }
  func.func @transform_5(%arg0: i32) -> (i32, i32) {
    %c0_i32 = arith.constant 0 : i32
    %c0_i32_0 = arith.constant 0 : i32
    %c0_i32_1 = arith.constant 0 : i32
    return %c0_i32, %c0_i32_0 : i32, i32
  }
  func.func @transform_6(%arg0: i32) -> (i32, i32) {
    %c0_i32 = arith.constant 0 : i32
    %c0_i32_0 = arith.constant 0 : i32
    %c0_i32_1 = arith.constant 0 : i32
    return %c0_i32, %c0_i32_0 : i32, i32
  }
  func.func @transform_7(%arg0: i32) -> (i32, i32) {
    %c0_i32 = arith.constant 0 : i32
    %c0_i32_0 = arith.constant 0 : i32
    %c0_i32_1 = arith.constant 0 : i32
    return %c0_i32, %c0_i32_0 : i32, i32
  }
  func.func @transform_8(%arg0: i32) -> (i32, i32) {
    %c0_i32 = arith.constant 0 : i32
    %c0_i32_0 = arith.constant 0 : i32
    %c0_i32_1 = arith.constant 0 : i32
    return %c0_i32, %c0_i32_0 : i32, i32
  }
  func.func @transform_9(%arg0: i32) -> (i32, i32) {
    %c0_i32 = arith.constant 0 : i32
    %c0_i32_0 = arith.constant 0 : i32
    %c0_i32_1 = arith.constant 0 : i32
    return %c0_i32, %c0_i32_0 : i32, i32
  }
  func.func @transform_10(%arg0: i32) -> (i32, i32) {
    %c0_i32 = arith.constant 0 : i32
    %c0_i32_0 = arith.constant 0 : i32
    %c0_i32_1 = arith.constant 0 : i32
    return %c0_i32, %c0_i32_0 : i32, i32
  }
  func.func @transform_11(%arg0: i32) -> (i32, i32) {
    %c0_i32 = arith.constant 0 : i32
    %c0_i32_0 = arith.constant 0 : i32
    %c0_i32_1 = arith.constant 0 : i32
    return %c0_i32, %c0_i32_0 : i32, i32
  }
  func.func @transform_12(%arg0: i32) -> (i32, i32) {
    %c0_i32 = arith.constant 0 : i32
    %c0_i32_0 = arith.constant 0 : i32
    %c0_i32_1 = arith.constant 0 : i32
    return %c0_i32, %c0_i32_0 : i32, i32
  }
  func.func @transform_13(%arg0: i32) -> (i32, i32) {
    %c0_i32 = arith.constant 0 : i32
    %c0_i32_0 = arith.constant 0 : i32
    %c0_i32_1 = arith.constant 0 : i32
    return %c0_i32, %c0_i32_0 : i32, i32
  }
  func.func @transform_14(%arg0: i32) -> (i32, i32, i32) {
    %c0_i32 = arith.constant 0 : i32
    %c0_i32_0 = arith.constant 0 : i32
    %c0_i32_1 = arith.constant 0 : i32
    return %arg0, %c0_i32, %c0_i32_0 : i32, i32, i32
  }
}

</mosaic_0001>

<bundles_post_ra>
// kernel: adapt_lowrank_bottleneck_forward.1
= control target key start
LH: loop header
LB: loop body
LE: loop exit
PB: predicated region body
PF: predicated region fallthrough
CT: control target
= control target key end

     0   :  { %s1294_s29 = smov 0   ;;  %s1507_s0 = inlined_call_operand.vmem [shape: f32[2,32,256], index: 0, kind: input, shape index: {}]   ;;  %s1508_s1 = inlined_call_operand.vmem [shape: f32[9,1,256], index: 1, kind: input, shape index: {}]   ;;  %s1509_s2 = inlined_call_operand.vmem [shape: bf16[4,32], index: 2, kind: input, shape index: {}]   ;;  %s1510_s3 = inlined_call_operand.vmem [shape: f32[4,1], index: 3, kind: input, shape index: {}]   ;;  %s1511_s4 = inlined_call_operand.vmem [shape: bf16[8,4], index: 4, kind: input, shape index: {}]   ;;  %s1512_s5 = inlined_call_operand.vmem [shape: f32[8,1], index: 5, kind: input, shape index: {}]   ;;  %s1513_s6 = inlined_call_operand.vmem [shape: bf16[4,72], index: 6, kind: input, shape index: {}]   ;;  %s1514_s7 = inlined_call_operand.vmem [shape: f32[4,1], index: 7, kind: input, shape index: {}]   ;;  %s1515_s8 = inlined_call_operand.vmem [shape: bf16[8,4], index: 8, kind: input, shape index: {}]   ;;  %s1516_s9 = inlined_call_operand.vmem [shape: f32[8,1], index: 9, kind: input, shape index: {}]   ;;  %s1517_s10 = inlined_call_operand.vmem [shape: bf16[4,8], index: 10, kind: input, shape index: {}]   ;;  %s1518_s11 = inlined_call_operand.vmem [shape: f32[4,1], index: 11, kind: input, shape index: {}]   ;;  %s1519_s12 = inlined_call_operand.vmem [shape: bf16[32,4], index: 12, kind: input, shape index: {}]   ;;  %s1520_s13 = inlined_call_operand.vmem [shape: f32[32,1], index: 13, kind: input, shape index: {}]   ;;  %s1521_s14 = inlined_call_operand.vmem [shape: f32[2,32,256], index: 14, kind: output, shape index: {}]  }
   0x1 LB: > { %s1147_s30 = sadd.s32 4294967295, %s1208_s29   ;;  %p1151_p0 = scmp.ge.s32.totalorder %s1208_s29, 1  ;;  %s1208_s29 = sphi %s1294_s29, %s24_s29  }
   0x2   : > { %p412_p1 = scmp.lt.s32.totalorder %s1208_s29, 3 }
   0x4   : > { %p413_p2 = pnand %p1151_p0, %p412_p1 }
   0x5   : > { %p458_p3 = scmp.lt.s32.totalorder (!%p413_p2), %s1147_s30, 1  ;;  %v1210_v0 = vmov (!%p413_p2), 0   ;;  %v482_v1 = vld [vmem:[%s1510_s3] sm:$0xf] (!%p413_p2)  ;;  %vm488_vm0 = vcmask (!%p413_p2), 261120   ;;  %vm546_vm1 = vcmask (!%p413_p2), 1041408   ;;  %v600_v40 = vlaneseq (!%p413_p2) }
   0x6   : > { %416 = sbr.rel (%p413_p2) target bundleno = 1515 (0x5eb), region = 76  ;;  %524 = vmatprep.mubr.bf16.mxu0 (!%p413_p2), %v1210_v0  ;;  %1198 = vset.pattern.permute.xlu0 (!%p413_p2), %v1210_v0  ;;  %v536_v2 = vld [vmem:[%s1512_s5] sm:$0xff] (!%p413_p2)  ;;  %vm542_vm2 = vcmask (!%p413_p2), 31744   ;;  %s1211_s27 = smov (!%p413_p2), 16   ;;  %v970_v38 = vld [vmem:[%s1520_s13 + $0x8] sm:$0xff] (!%p413_p2)  ;;  %v972_v39 = vld [vmem:[%s1520_s13 + $0x18] sm:$0xff] (!%p413_p2) }
   0x7   : > { %485 = vperm.xlu0 (!%p413_p2), %1198, %v482_v1   ;;  %585 = vmatprep.mubr.bf16.mxu1 (!%p413_p2), %v1210_v0  ;;  %v477_v15 = vld [vmem:[%s1509_s2] sm:$0x3] (!%p413_p2)  ;;  %s1212_s28 = smov (!%p413_p2), 17   ;;  %s1213_s15 = smov (!%p413_p2), 15   ;;  %v608_v41 = vshrl.u32 (!%p413_p2), %v600_v40, 7  ;;  %v1387_v44 = vand.u32 (!%p413_p2), 127, %v600_v40 }
   0x8   : > { %1199 = vset.pattern.permute.xlu1 (!%p413_p2), %v1210_v0  ;;  %v533_v26 = vld [vmem:[%s1511_s4] sm:$0xf] (!%p413_p2)  ;;  %s1214_s16 = smov (!%p413_p2), 1   ;;  %s1215_s17 = smov (!%p413_p2), 127   ;;  %vm794_vm11 = vcmask (!%p413_p2), 1043456   ;;  %vm790_vm12 = vcmask (!%p413_p2), 588800  }
   0x9   : > { %s1216_s18 = smov (!%p413_p2), 113   ;;  %s1217_s20 = smov (!%p413_p2), 112   ;;  %v784_v36 = vld [vmem:[%s1514_s7] sm:$0xf] (!%p413_p2)  ;;  %v1389_v45 = vsub.s32 (!%p413_p2), 0, %v608_v41  ;;  %v1394_v47 = vsub.s32 (!%p413_p2), 1, %v608_v41 }
   0xa   : > { %s1218_s21 = smov (!%p413_p2), 111   ;;  %v906_v37 = vld [vmem:[%s1518_s11] sm:$0xf] (!%p413_p2)  ;;  %vm602_vm3 = vcmp.lt.s32.totalorder (!%p413_p2), %v1387_v44, 17  ;;  %vm623_vm4 = vcmp.lt.s32.totalorder (!%p413_p2), %v1387_v44, 16  ;;  %vm645_vm5 = vcmp.lt.s32.totalorder (!%p413_p2), %v1387_v44, 15 }
   0xb   : > { %539 = vperm.xlu0 (!%p413_p2), %1198, %v536_v2   ;;  %v605_v46 = vld [vmem:[%s1508_s1] sm:$0x3] (!%p413_p2)  ;;  %v1159_v48 = vld [vmem:[%s1508_s1 + $0x2] sm:$0x3] (!%p413_p2)  ;;  %v1160_v2 = vld [vmem:[%s1508_s1 + $0x4] sm:$0x3] (!%p413_p2) }
   0xc   : > { %v610_v51 = vrot.slane (!%p413_p2), %v605_v46, %v1389_v45  ;;  %v614_v52 = vrot.slane (!%p413_p2), %v605_v46, %v1394_v47  ;;  %v632_v53 = vrot.slane (!%p413_p2), %v1159_v48, %v1389_v45  ;;  %v636_v54 = vrot.slane (!%p413_p2), %v1159_v48, %v1394_v47 }
   0xd   : > { %s1523_s30 = smov (!%p458_p3, %s1147_s30), 1  ;;  %vm667_vm6 = vcmp.lt.s32.totalorder %v1387_v44, 1  ;;  %vm689_vm7 = vcmp.lt.s32.totalorder %v1387_v44, 127  ;;  %vm711_vm8 = vcmp.lt.s32.totalorder %v1387_v44, 113  ;;  %vm733_vm9 = vcmp.lt.s32.totalorder %v1387_v44, 112 }
   0xe   : > { %s1179_s19 = sshll.u32 %s1523_s30, 6  ;;  %vm755_vm10 = vcmp.lt.s32.totalorder %v1387_v44, 111  ;;  %vm912_vm13 = vcmask 64512  }
   0xf   : > { %s462_s22 = scalar_lea.vmem %s1507_s0, %s1179_s19  ;;  %s1487_s25 = scalar_lea.vmem %s1521_s14, %s1179_s19 }
  0x10   : > { %v1320_v3 = vld [vmem:[%s462_s22 + $0x8] sm:$0xff]  ;;  %v1322_v4 = vld [vmem:[%s462_s22 + $0x18] sm:$0xff]  ;;  %v1324_v5 = vld [vmem:[%s462_s22] sm:$0xff] }
  0x11   : > { %v479_v6 = vpack.c.bf16 %v1322_v4, %v1320_v3  ;;  %v1328_v7 = vld [vmem:[%s462_s22 + $0x10] sm:$0xff]  ;;  %v1330_v8 = vld [vmem:[%s462_s22 + $0x28] sm:$0xff]  ;;  %v1332_v9 = vld [vmem:[%s462_s22 + $0x38] sm:$0xff] }
  0x12   : > { %v478_v10 = vpack.c.bf16 %v1328_v7, %v1324_v5  ;;  %v481_v11 = vpack.c.bf16 %v1332_v9, %v1330_v8  ;;  %v1338_v12 = vld [vmem:[%s462_s22 + $0x20] sm:$0xff]  ;;  %v1340_v13 = vld [vmem:[%s462_s22 + $0x30] sm:$0xff] }
  0x13   : > { %492 = vmatprep.subr.bf16.mxu0 %v479_v6  ;;  %v480_v14 = vpack.c.bf16 %v1340_v13, %v1338_v12  ;;  %v1161_v6 = vld [vmem:[%s1508_s1 + $0x6] sm:$0x3] }
  0x14   : > { %493 = vmatpush1.bf16.msra.mxu0 %v478_v10 }
  0x15   : > { %494 = vmatprep.subr.bf16.mxu0 %v481_v11 }
  0x18   : > { %495 = vmatpush1.bf16.msra.mxu0 %v480_v14 }
  0x1b   : > { %1156 = vmatmul.mubr.msk.bf16.vlgmr.msra.gmra.mrb[0].mxu0 %vm488_vm0, %v477_v15  ;;  %v654_v15 = vrot.slane %v1160_v2, %v1389_v45 }
  0x1c   : > { %954 = vmatprep.mubr.bf16.mxu0 %v1210_v0 }
  0x86   : > { %v486_v16 = vpop.permute.xlu0 %485 }
  0x8a   : > { %v540_v27 = vpop.permute.xlu0 %539 }
  0xee   : > { %v526_v17 = vpop.f32.mrb[0].mxu0 }
  0xef   : > { %v527_v18 = vadd.f32 %v526_v17, %v486_v16  ;;  %v528_v19 = vpop.f32.mrb[1].mxu0  ;;  %v658_v17 = vrot.slane %v1160_v2, %v1394_v47 }
  0xf0   : > { %v529_v20 = vadd.f32 %v528_v19, %v486_v16  ;;  %v530_v21 = vpop.f32.mrb[2].mxu0  ;;  %v680_v19 = vrot.slane %v1161_v6, %v1394_v47 }
  0xf1   : > { %v534_v22 = vpack.c.bf16 %v527_v18, %v527_v18  ;;  %v531_v23 = vpop.f32.mrb[3].mxu0  ;;  %v676_v18 = vrot.slane %v1161_v6, %v1389_v45 }
  0xf2   : > { %v535_v24 = vpack.c.bf16 %v529_v20, %v529_v20  ;;  %v1162_v20 = vld [vmem:[%s1508_s1 + $0xa] sm:$0x3] }
  0xf3   : > { %v548_v25 = vsel %vm546_vm1, %v534_v22, 0 }
  0xf4   : > { %1157 = vmatprep.subr.msk.bf16.mxu1 %vm546_vm1, %v535_v24 }
  0xf5   : > { %554 = vmatpush1.bf16.msra.mxu1 %v548_v25 }
  0xf8   : > { %1158 = vmatmul.mubr.msk.bf16.vlgmr.msra.gmra.mrb[0].mxu1 %vm542_vm2, %v533_v26  ;;  %v698_v26 = vrot.slane %v1162_v20, %v1389_v45 }
  0xf9   : > { %833 = vmatprep.mubr.bf16.mxu1 %v1210_v0 }
 0x1cb   : > { %v587_v28 = vpop.f32.mrb[0].mxu1 }
 0x1cc   : > { %v588_v29 = vadd.f32 %v587_v28, %v540_v27  ;;  %v589_v30 = vpop.f32.mrb[1].mxu1 }
 0x1cd   : > { %v591_v31 = vpop.f32.mrb[2].mxu1  ;;  %v590_v33 = vadd.f32 %v589_v30, %v540_v27  ;;  %v702_v27 = vrot.slane %v1162_v20, %v1394_v47  ;;  %v969_v20 = vld [vmem:[%s1520_s13] sm:$0xff] }
 0x1ce   : > { %v1355_v32 = vmax.f32 %v588_v29, 0.0  ;;  %v592_v34 = vpop.f32.mrb[3].mxu1 }
 0x1cf   : > { %v1359_v35 = vmax.f32 %v590_v33, 0.0 }
 0x1d0   : > { %619 = vrot.lane.b32.xlu0 %v1355_v32, %s1211_s27  ;;  %596 = vrot.lane.b32.xlu1 %v1355_v32, %s1212_s28 }
 0x1d4   : > { %641 = vrot.lane.b32.xlu0 %v1355_v32, %s1213_s15  ;;  %598 = vrot.lane.b32.xlu1 %v1359_v35, %s1212_s28 }
 0x1d8   : > { %663 = vrot.lane.b32.xlu0 %v1355_v32, %s1214_s16  ;;  %621 = vrot.lane.b32.xlu1 %v1359_v35, %s1211_s27 }
 0x1dc   : > { %685 = vrot.lane.b32.xlu0 %v1355_v32, %s1215_s17  ;;  %643 = vrot.lane.b32.xlu1 %v1359_v35, %s1213_s15 }
 0x1e0   : > { %707 = vrot.lane.b32.xlu0 %v1355_v32, %s1216_s18  ;;  %665 = vrot.lane.b32.xlu1 %v1359_v35, %s1214_s16 }
 0x1e4   : > { %729 = vrot.lane.b32.xlu0 %v1355_v32, %s1217_s20  ;;  %687 = vrot.lane.b32.xlu1 %v1359_v35, %s1215_s17 }
 0x1e8   : > { %751 = vrot.lane.b32.xlu0 %v1355_v32, %s1218_s21  ;;  %709 = vrot.lane.b32.xlu1 %v1359_v35, %s1216_s18 }
 0x1ec   : > { %787 = vperm.xlu0 %1198, %v784_v36   ;;  %731 = vrot.lane.b32.xlu1 %v1359_v35, %s1217_s20 }
 0x1f0   : > { %909 = vperm.xlu0 %1198, %v906_v37   ;;  %753 = vrot.lane.b32.xlu1 %v1359_v35, %s1218_s21 }
 0x1f4   : > { %980 = vperm.xlu0 %1198, %v970_v38  }
 0x1f8   : > { %990 = vperm.xlu0 %1198, %v972_v39  }
 0x242   : > { %v620_v42 = vpop.permute.xlu0 %619  ;;  %v597_v43 = vpop.permute.xlu1 %596 }
 0x246   : > { %v642_v49 = vpop.permute.xlu0 %641  ;;  %v599_v50 = vpop.permute.xlu1 %598 }
 0x247   : > { %v603_v55 = vsel %vm602_vm3, %v597_v43, %v599_v50  ;;  %v604_v56 = vsel %vm602_vm3, %v599_v50, %v597_v43  ;;  %v1164_v43 = vld [vmem:[%s1508_s1 + $0xe] sm:$0x3] }
 0x248   : > { %v617_v61 = vmul.f32 %v610_v51, %v604_v56  ;;  %v618_v62 = vmul.f32 %v614_v52, %v603_v55 }
 0x24a   : > { %v664_v57 = vpop.permute.xlu0 %663  ;;  %v622_v58 = vpop.permute.xlu1 %621 }
 0x24b   : > { %v624_v59 = vsel %vm623_vm4, %v620_v42, %v622_v58  ;;  %v625_v60 = vsel %vm623_vm4, %v622_v58, %v620_v42  ;;  %v1163_v42 = vld [vmem:[%s1508_s1 + $0xc] sm:$0x3] }
 0x24c   : > { %v639_v63 = vmul.f32 %v632_v53, %v625_v60  ;;  %v640_v1 = vmul.f32 %v636_v54, %v624_v59  ;;  %v720_v50 = vrot.slane %v1163_v42, %v1389_v45  ;;  %v724_v52 = vrot.slane %v1163_v42, %v1394_v47 }
 0x24d   : > { %v742_v53 = vrot.slane %v1164_v43, %v1389_v45  ;;  %v746_v54 = vrot.slane %v1164_v43, %v1394_v47 }
 0x24e   : > { %v773_v10 = vpack.c.bf16 %v639_v63, %v617_v61  ;;  %v644_v11 = vpop.permute.xlu1 %643  ;;  %v774_v14 = vpack.c.bf16 %v640_v1, %v618_v62  ;;  %v686_v16 = vpop.permute.xlu0 %685 }
 0x24f   : > { %v646_v21 = vsel %vm645_vm5, %v642_v49, %v644_v11  ;;  %v647_v22 = vsel %vm645_vm5, %v644_v11, %v642_v49 }
 0x250   : > { %801 = vmatprep.subr.bf16.mxu1 %v774_v14  ;;  %v661_v28 = vmul.f32 %v654_v15, %v647_v22  ;;  %v662_v29 = vmul.f32 %v658_v17, %v646_v21  ;;  %v971_v21 = vld [vmem:[%s1520_s13 + $0x10] sm:$0xff] }
 0x251   : > { %802 = vmatpush1.bf16.msra.mxu1 %v773_v10 }
 0x252   : > { %v666_v23 = vpop.permute.xlu1 %665  ;;  %v708_v33 = vpop.permute.xlu0 %707 }
 0x253   : > { %v668_v24 = vsel %vm667_vm6, %v664_v57, %v666_v23  ;;  %v669_v25 = vsel %vm667_vm6, %v666_v23, %v664_v57 }
 0x254   : > { %v683_v30 = vmul.f32 %v676_v18, %v669_v25  ;;  %v684_v31 = vmul.f32 %v680_v19, %v668_v24  ;;  %v845_v19 = vld [vmem:[%s1516_s9] sm:$0xff] }
 0x255   : > { %848 = vperm.xlu1 %1199, %v845_v19  }
 0x256   : > { %v775_v34 = vpack.c.bf16 %v683_v30, %v661_v28  ;;  %v688_v36 = vpop.permute.xlu1 %687  ;;  %v776_v37 = vpack.c.bf16 %v684_v31, %v662_v29  ;;  %v730_v51 = vpop.permute.xlu0 %729 }
 0x257   : > { %v690_v38 = vsel %vm689_vm7, %v686_v16, %v688_v36  ;;  %v691_v39 = vsel %vm689_vm7, %v688_v36, %v686_v16 }
 0x258   : > { %v705_v40 = vmul.f32 %v698_v26, %v690_v38  ;;  %v706_v41 = vmul.f32 %v702_v27, %v691_v39  ;;  %803 = vmatprep.subr.bf16.mxu1 %v776_v37 }
 0x259   : > { %804 = vmatpush1.bf16.msra.mxu1 %v775_v34  ;;  %975 = vperm.xlu1 %1199, %v969_v20  }
 0x25a   : > { %v777_v46 = vpack.c.bf16 %v705_v40, %v1355_v32  ;;  %v710_v48 = vpop.permute.xlu1 %709  ;;  %v778_v49 = vpack.c.bf16 %v706_v41, %v1359_v35  ;;  %v1165_v32 = vld [vmem:[%s1508_s1 + $0x10] sm:$0x3]  ;;  %v752_v2 = vpop.permute.xlu0 %751 }
 0x25b   : > { %v712_v55 = vsel %vm711_vm8, %v708_v33, %v710_v48  ;;  %v713_v56 = vsel %vm711_vm8, %v710_v48, %v708_v33  ;;  %v764_v59 = vrot.slane %v1165_v32, %v1389_v45  ;;  %v768_v60 = vrot.slane %v1165_v32, %v1394_v47  ;;  %v783_v47 = vld [vmem:[%s1513_s6] sm:$0x3] }
 0x25c   : > { %805 = vmatprep.subr.bf16.mxu1 %v778_v49  ;;  %v727_v61 = vmul.f32 %v720_v50, %v712_v55  ;;  %v728_v62 = vmul.f32 %v724_v52, %v713_v56  ;;  %v842_v33 = vld [vmem:[%s1515_s8] sm:$0xf] }
 0x25d   : > { %806 = vmatpush1.bf16.msra.mxu1 %v777_v46  ;;  %985 = vperm.xlu1 %1199, %v971_v21   ;;  %v903_v50 = vld [vmem:[%s1517_s10] sm:$0x3] }
 0x25e   : > { %v732_v35 = vpop.permute.xlu1 %731 }
 0x25f   : > { %v734_v57 = vsel %vm733_vm9, %v730_v51, %v732_v35  ;;  %v735_v58 = vsel %vm733_vm9, %v732_v35, %v730_v51 }
 0x260   : > { %v749_v63 = vmul.f32 %v742_v53, %v734_v57  ;;  %v750_v1 = vmul.f32 %v746_v54, %v735_v58 }
 0x262   : > { %v779_v6 = vpack.c.bf16 %v749_v63, %v727_v61  ;;  %v754_v10 = vpop.permute.xlu1 %753  ;;  %v780_v11 = vpack.c.bf16 %v750_v1, %v728_v62 }
 0x263   : > { %v756_v14 = vsel %vm755_vm10, %v752_v2, %v754_v10  ;;  %v757_v15 = vsel %vm755_vm10, %v754_v10, %v752_v2 }
 0x264   : > { %v771_v16 = vmul.f32 %v764_v59, %v756_v14  ;;  %v772_v17 = vmul.f32 %v768_v60, %v757_v15  ;;  %807 = vmatprep.subr.bf16.mxu1 %v780_v11  ;;  %v1200_v59 = vld [vmem:[%s1519_s12] sm:$0xff]   ;;  %v1201_v60 = vld [vmem:[%s1519_s12 + $0x8] sm:$0xff]  }
 0x265   : > { %808 = vmatpush1.bf16.msra.mxu1 %v779_v6 }
 0x266   : > { %v781_v44 = vpack.c.bf16 %v771_v16, %v771_v16  ;;  %v782_v18 = vpack.c.bf16 %v772_v17, %v772_v17 }
 0x268   : > { %1166 = vmatprep.subr.msk.bf16.mxu1 %vm794_vm11, %v782_v18  ;;  %v796_v45 = vsel %vm794_vm11, %v781_v44, 0 }
 0x269   : > { %810 = vmatpush1.bf16.msra.mxu1 %v796_v45 }
 0x26b   : > { %v788_v22 = vpop.permute.xlu0 %787 }
 0x26c   : > { %1167 = vmatmul.mubr.msk.bf16.vlgmr.msra.gmra.mrb[4].mxu1 %vm790_vm12, %v783_v47 }
 0x26d   : > { %892 = vmatprep.mubr.bf16.mxu1 %v1210_v0 }
 0x26f   : > { %v910_v51 = vpop.permute.xlu0 %909 }
 0x273   : > { %v981_v2 = vpop.permute.xlu0 %980 }
 0x2d4   : > { %v849_v34 = vpop.permute.xlu1 %848 }
 0x2d8   : > { %v976_v61 = vpop.permute.xlu1 %975 }
 0x2dc   : > { %v986_v47 = vpop.permute.xlu1 %985 }
 0x33f   : > { %v835_v23 = vpop.f32.mrb[4].mxu1 }
 0x340   : > { %v836_v24 = vadd.f32 %v835_v23, %v788_v22  ;;  %v837_v25 = vpop.f32.mrb[5].mxu1 }
 0x341   : > { %v838_v26 = vadd.f32 %v837_v25, %v788_v22  ;;  %v839_v27 = vpop.f32.mrb[6].mxu1 }
 0x342   : > { %v843_v28 = vpack.c.bf16 %v836_v24, %v836_v24  ;;  %v840_v29 = vpop.f32.mrb[7].mxu1 }
 0x343   : > { %v844_v30 = vpack.c.bf16 %v838_v26, %v838_v26 }
 0x344   : > { %v855_v31 = vsel %vm546_vm1, %v843_v28, 0 }
 0x345   : > { %1168 = vmatprep.subr.msk.bf16.mxu1 %vm546_vm1, %v844_v30 }
 0x346   : > { %861 = vmatpush1.bf16.msra.mxu1 %v855_v31 }
 0x349   : > { %1169 = vmatmul.mubr.msk.bf16.vlgmr.msra.gmra.mrb[8].mxu1 %vm542_vm2, %v842_v33 }
 0x41c   : > { %v894_v36 = vpop.f32.mrb[8].mxu1 }
 0x41d   : > { %v895_v37 = vadd.f32 %v894_v36, %v849_v34  ;;  %v896_v38 = vpop.f32.mrb[9].mxu1 }
 0x41e   : > { %v897_v39 = vadd.f32 %v896_v38, %v849_v34  ;;  %v898_v40 = vpop.f32.mrb[10].mxu1 }
 0x41f   : > { %v901_v41 = vmax.f32 %v895_v37, 0.0  ;;  %v899_v42 = vpop.f32.mrb[11].mxu1 }
 0x420   : > { %v902_v43 = vmax.f32 %v897_v39, 0.0 }
 0x421   : > { %v904_v46 = vpack.c.bf16 %v901_v41, %v901_v41 }
 0x422   : > { %v905_v48 = vpack.c.bf16 %v902_v43, %v902_v43 }
 0x423   : > { %v917_v49 = vsel %vm794_vm11, %v904_v46, 0 }
 0x424   : > { %1170 = vmatprep.subr.msk.bf16.mxu0 %vm794_vm11, %v905_v48 }
 0x425   : > { %923 = vmatpush1.bf16.msra.mxu0 %v917_v49 }
 0x428   : > { %1171 = vmatmul.mubr.msk.bf16.vlgmr.msra.gmra.mrb[4].mxu0 %vm912_vm13, %v903_v50 }
 0x429   : > { %1047 = vmatprep.mubr.bf16.mxu0 %v1210_v0 }
 0x4fb   : > { %v956_v52 = vpop.f32.mrb[4].mxu0 }
 0x4fc   : > { %v957_v53 = vadd.f32 %v956_v52, %v910_v51  ;;  %v958_v54 = vpop.f32.mrb[5].mxu0 }
 0x4fd   : > { %v959_v32 = vadd.f32 %v958_v54, %v910_v51  ;;  %v960_v55 = vpop.f32.mrb[6].mxu0 }
 0x4fe   : > { %v967_v56 = vpack.c.bf16 %v957_v53, %v957_v53  ;;  %v961_v35 = vpop.f32.mrb[7].mxu0 }
 0x4ff   : > { %v968_v57 = vpack.c.bf16 %v959_v32, %v959_v32 }
 0x500   : > { %v1010_v58 = vsel %vm546_vm1, %v967_v56, 0 }
 0x501   : > { %1174 = vmatprep.subr.msk.bf16.mxu0 %vm546_vm1, %v968_v57 }
 0x502   : > { %1016 = vmatpush1.bf16.msra.mxu0 %v1010_v58 }
 0x505   : > { %1175 = vmatmul.mubr.msk.bf16.vlgmr.msra.gmra.mrb[8].mxu0 %vm542_vm2, %v1200_v59 }
 0x506   : > { %1057 = vmatprep.mubr.bf16.mxu0 %v1210_v0 }
 0x50d   : > { %1176 = vmatmul.mubr.msk.bf16.gmra.mrb[12].mxu0 %vm542_vm2, %v1201_v60 }
 0x5d8   : > { %v1049_v62 = vpop.f32.mrb[8].mxu0 }
 0x5d9   : > { %v1050_v63 = vadd.f32 %v1049_v62, %v976_v61  ;;  %v1051_v1 = vpop.f32.mrb[9].mxu0 }
 0x5da   : > { %v1052_v6 = vadd.f32 %v1051_v1, %v976_v61  ;;  %v1053_v10 = vpop.f32.mrb[10].mxu0 }
 0x5db   : > { %v1068_v11 = vadd.f32 %v1050_v63, %v1324_v5  ;;  %v1054_v14 = vadd.f32 %v1053_v10, %v981_v2  ;;  %v1055_v15 = vpop.f32.mrb[11].mxu0 }
 0x5dc   : > { %v1069_v0 = vadd.f32 %v1052_v6, %v1320_v3  ;;  %v1056_v16 = vadd.f32 %v1055_v15, %v981_v2  ;;  %v991_v3 = vpop.permute.xlu0 %990 }
 0x5dd   : > { %v1076_v17 = vmax.f32 %v1068_v11, 0.0  ;;  %v1070_v44 = vadd.f32 %v1054_v14, %v1328_v7 }
 0x5de   : > { %v1077_v18 = vmax.f32 %v1069_v0, 0.0  ;;  %v1071_v5 = vadd.f32 %v1056_v16, %v1322_v4 }
 0x5df   : > { %1084 = vst [vmem:[%s1487_s25] sm:$0xff] %v1076_v17  ;;  %v1078_v45 = vmax.f32 %v1070_v44, 0.0 }
 0x5e0   : > { %1085 = vst [vmem:[%s1487_s25 + $0x8] sm:$0xff] %v1077_v18  ;;  %v1079_v19 = vmax.f32 %v1071_v5, 0.0  ;;  %v1059_v20 = vpop.f32.mrb[12].mxu0 }
 0x5e1   : > { %1086 = vst [vmem:[%s1487_s25 + $0x10] sm:$0xff] %v1078_v45  ;;  %v1060_v21 = vadd.f32 %v1059_v20, %v986_v47  ;;  %v1061_v22 = vpop.f32.mrb[13].mxu0 }
 0x5e2   : > { %1087 = vst [vmem:[%s1487_s25 + $0x18] sm:$0xff] %v1079_v19  ;;  %v1062_v23 = vadd.f32 %v1061_v22, %v986_v47  ;;  %v1063_v7 = vpop.f32.mrb[14].mxu0 }
 0x5e3   : > { %v1072_v24 = vadd.f32 %v1060_v21, %v1338_v12  ;;  %v1064_v4 = vadd.f32 %v1063_v7, %v991_v3  ;;  %v1065_v25 = vpop.f32.mrb[15].mxu0 }
 0x5e4   : > { %v1073_v26 = vadd.f32 %v1062_v23, %v1330_v8  ;;  %v1066_v27 = vadd.f32 %v1065_v25, %v991_v3 }
 0x5e5   : > { %v1080_v28 = vmax.f32 %v1072_v24, 0.0  ;;  %v1074_v29 = vadd.f32 %v1064_v4, %v1340_v13 }
 0x5e6   : > { %v1081_v30 = vmax.f32 %v1073_v26, 0.0  ;;  %v1075_v31 = vadd.f32 %v1066_v27, %v1332_v9 }
 0x5e7   : > { %1088 = vst [vmem:[%s1487_s25 + $0x20] sm:$0xff] %v1080_v28  ;;  %v1082_v33 = vmax.f32 %v1074_v29, 0.0 }
 0x5e8   : > { %1089 = vst [vmem:[%s1487_s25 + $0x28] sm:$0xff] %v1081_v30  ;;  %v1083_v34 = vmax.f32 %v1075_v31, 0.0 }
 0x5e9   : > { %1090 = vst [vmem:[%s1487_s25 + $0x30] sm:$0xff] %v1082_v33 }
 0x5ea   : > { %1091 = vst [vmem:[%s1487_s25 + $0x38] sm:$0xff] %v1083_v34 }
 0x5eb PF: > { %s24_s29 = sadd.s32 1, %s1208_s29  }
 0x5ec   : > { %p21_p4 = scmp.ge.s32.totalorder %s24_s29, 4  }
 0x5ee   :  { %23 = sbr.rel (!%p21_p4) target bundleno = 1 (0x1), region = 113 }

</bundles_post_ra>
